<compile_context>
chip_gen: v5e
topology: v5e:2x2
jax: 0.10.0
libtpu: 0.0.40
codegen_flags: <defaults>
</compile_context>

<pallas_src>
import math

import jax
import jax.numpy as jnp
from jax.experimental import pallas as pl
from jax.experimental.pallas import tpu as pltpu


def make_positional_encoding(d_model: int, max_len: int = 5000) -> jnp.ndarray:
    """Replicates the torch __init__ pe buffer: shape (max_len, d_model), f32."""
    position = jnp.arange(0, max_len, dtype=jnp.float32)[:, None]              # (L, 1)
    div_term = jnp.exp(
        jnp.arange(0, d_model, 2, dtype=jnp.float32) * (-math.log(10000.0) / d_model)
    )                                                                          # (D/2,)
    angles = position * div_term                                               # (L, D/2)
    pe = jnp.zeros((max_len, d_model), dtype=jnp.float32)
    pe = pe.at[:, 0::2].set(jnp.sin(angles))
    pe = pe.at[:, 1::2].set(jnp.cos(angles))
    return pe


def _pe_add_kernel(x_ref, pe_ref, o_ref):
    # x_ref: (TB, TC) or (TB, TS, D); pe_ref: (1, TC) or (1, TS, D).
    # Plain broadcast add over the batch axis; lane-dense full-width stores on
    # the primary path.
    o_ref[...] = x_ref[...] + pe_ref[...]


def _chip_budgets():
    """Per-generation block / VMEM budgets.

    v5e/v6e (128 MiB physical VMEM): bigger blocks recover the last few % of
    HBM roofline.  v7x (64 MiB VMEM, ~3.2 TB/s HBM): cap blocks at ~2 MiB and
    deepen the input pipeline instead.
    """
    kind = ""
    try:
        kind = jax.devices()[0].device_kind.lower()
    except Exception:
        pass
    if "v7" in kind or "7x" in kind:
        return {"target_bytes": 2 << 20, "vmem_limit": 40 << 20, "buffers": 3}
    if "v6" in kind:
        return {"target_bytes": 6 << 20, "vmem_limit": 48 << 20, "buffers": 2}
    # v5e / unknown: 128 MiB physical but only 16 MiB scoped default -> raise it.
    return {"target_bytes": 4 << 20, "vmem_limit": 40 << 20, "buffers": 2}


def _row_tile(batch: int, itemsize: int) -> int:
    """Sublane-packing-aware batch tile: 8 for f32, 16 for bf16, 32 for int8."""
    pack = max(8, 32 // max(itemsize, 1))
    return batch if batch <= pack else pack


def _col_tile(sd: int, rows: int, itemsize: int, target_bytes: int) -> int:
    """Largest multiple of 128 dividing `sd` keeping one block <= target_bytes."""
    best = 128
    tc = 128
    while tc <= sd:
        if sd % tc == 0 and rows * tc * itemsize <= target_bytes:
            best = tc
        tc += 128
    return min(best, sd)


def _seq_tile(seq: int, rows: int, d: int, itemsize: int, target_bytes: int) -> int:
    """Sequence tile (multiple of 8) for the 3-D fallback, block <= target_bytes."""
    if seq <= 8:
        return seq
    best = 8
    ts = 8
    while ts <= seq:
        if rows * ts * d * itemsize <= target_bytes:
            best = ts
        else:
            break  # monotone in ts
        ts += 8
    return best


def positional_encoding_forward(x: jnp.ndarray, pe: jnp.ndarray) -> jnp.ndarray:
    """x: (B, S, D); pe: (max_len, D). Returns x + pe[:S] broadcast over batch."""
    B, S, D = x.shape
    dtype = x.dtype
    itemsize = jnp.dtype(dtype).itemsize
    budgets = _chip_budgets()
    target_bytes = budgets["target_bytes"]

    TB = _row_tile(B, itemsize)
    pe_active = pe[:S, :].astype(dtype)          # slice + cast once (wrapper-side)

    cost = pl.CostEstimate(
        flops=B * S * D,
        transcendentals=0,
        bytes_accessed=(2 * B * S * D + S * D) * itemsize,
    )
    cparams = pltpu.CompilerParams(
        dimension_semantics=("parallel", "parallel"),
        vmem_limit_bytes=budgets["vmem_limit"],
    )

    SD = S * D

    if SD % 128 == 0:
        # ---- Primary lane-dense 2-D path -----------------------------------
        x2 = x.reshape(B, SD)
        pe2 = pe_active.reshape(1, SD)
        TC = _col_tile(SD, TB, itemsize, target_bytes)
        # Column tiles OUTER, batch tiles INNER: pe block index (0, j) is
        # constant across the inner axis -> its DMA is skipped on revisits.
        grid = (SD // TC, pl.cdiv(B, TB))

        def call(buffers):
            if buffers > 2:
                x_spec = pl.BlockSpec((TB, TC), lambda j, i: (i, j),
                                      pipeline_mode=pl.Buffered(buffers))
            else:
                x_spec = pl.BlockSpec((TB, TC), lambda j, i: (i, j))
            return pl.pallas_call(
                _pe_add_kernel,
                out_shape=jax.ShapeDtypeStruct((B, SD), dtype),
                grid_spec=pltpu.PrefetchScalarGridSpec(
                    num_scalar_prefetch=0,
                    grid=grid,
                    in_specs=[
                        x_spec,                                           # x tile
                        pl.BlockSpec((1, TC), lambda j, i: (0, j)),       # pe tile
                    ],
                    out_specs=pl.BlockSpec((TB, TC), lambda j, i: (i, j)),
                ),
                compiler_params=cparams,
                cost_estimate=cost,
            )(x2, pe2)

        try:
            out2 = call(budgets["buffers"])
        except Exception:
            out2 = call(2)   # conservative fallback (e.g. Buffered unsupported)
        return out2.reshape(B, S, D)

    # ---- Fallback 3-D path: S*D not a multiple of 128 -----------------------
    # Block (TB, TS, D): D is the full last dim (legal regardless of size),
    # TS is a multiple of 8 (or == S).  Keeps blocks bounded and pipelined for
    # arbitrary (S, D) instead of one giant unpipelined (TB, S*D) block.
    pe3 = pe_active[None, :, :]                                         # (1, S, D)
    TS = _seq_tile(S, TB, D, itemsize, target_bytes)
    grid = (pl.cdiv(S, TS), pl.cdiv(B, TB))   # seq tiles OUTER, batch INNER

    def call3(buffers):
        if buffers > 2:
            x_spec = pl.BlockSpec((TB, TS, D), lambda s, b: (b, s, 0),
                                  pipeline_mode=pl.Buffered(buffers))
        else:
            x_spec = pl.BlockSpec((TB, TS, D), lambda s, b: (b, s, 0))
        return pl.pallas_call(
            _pe_add_kernel,
            out_shape=jax.ShapeDtypeStruct((B, S, D), dtype),
            grid_spec=pltpu.PrefetchScalarGridSpec(
                num_scalar_prefetch=0,
                grid=grid,
                in_specs=[
                    x_spec,                                               # x tile
                    pl.BlockSpec((1, TS, D), lambda s, b: (0, s, 0)),     # pe tile
                ],
                out_specs=pl.BlockSpec((TB, TS, D), lambda s, b: (b, s, 0)),
            ),
            compiler_params=cparams,
            cost_estimate=cost,
        )(x, pe3)

    try:
        return call3(budgets["buffers"])
    except Exception:
        return call3(2)


if __name__ == "__main__":
    # Small shapes consistent with the module: batch=2, seq=8, d_model=32.
    B, S, D = 2, 8, 32
    max_len = 64  # any max_len >= S; module default is 5000

    key = jax.random.PRNGKey(0)
    x = jax.random.normal(key, (B, S, D), dtype=jnp.float32)
    pe = make_positional_encoding(D, max_len)

    out = jax.block_until_ready(positional_encoding_forward(x, pe))

    ref = x + pe[None, :S, :]
    assert out.shape == (B, S, D)
    assert jnp.allclose(out, ref, atol=1e-6), "mismatch vs reference (2-D path)"

    # Also exercise the hardened non-128-aligned (3-D fallback) path once.
    D2 = 24  # S*D2 = 192, not a multiple of 128
    x2 = jax.random.normal(jax.random.PRNGKey(1), (B, S, D2), dtype=jnp.float32)
    pe2 = make_positional_encoding(D2, max_len)
    out2 = jax.block_until_ready(positional_encoding_forward(x2, pe2))
    ref2 = x2 + pe2[None, :S, :]
    assert jnp.allclose(out2, ref2, atol=1e-6), "mismatch vs reference (3-D path)"

    print("KERNEL_OK")
</pallas_src>

<mosaic_0001>
module attributes {stable_mosaic.version = 11 : i64} {
  func.func @_pe_add_kernel(%arg0: i32, %arg1: i32, %arg2: memref<2x256xf32, #tpu.memory_space<vmem>>, %arg3: memref<1x256xf32, #tpu.memory_space<vmem>>, %arg4: memref<2x256xf32, #tpu.memory_space<vmem>>) attributes {dimension_semantics = [#tpu.dimension_semantics<parallel>, #tpu.dimension_semantics<parallel>], iteration_bounds = array<i64: 1, 1>, scalar_prefetch = 0 : i64, scratch_operands = 0 : i64, tpu.core_type = #tpu.core_type<tc>, window_params = [{transform_indices = @transform_0, window_bounds = array<i64: 2, 256>}, {transform_indices = @transform_1, window_bounds = array<i64: 1, 256>}, {transform_indices = @transform_2, window_bounds = array<i64: 2, 256>}]} {
    %c0 = arith.constant 0 : index
    %c0_0 = arith.constant 0 : index
    %0 = vector.load %arg2[%c0, %c0_0] : memref<2x256xf32, #tpu.memory_space<vmem>>, vector<2x256xf32>
    %c0_1 = arith.constant 0 : index
    %c0_2 = arith.constant 0 : index
    %1 = vector.load %arg3[%c0_1, %c0_2] : memref<1x256xf32, #tpu.memory_space<vmem>>, vector<1x256xf32>
    %2 = vector.broadcast %1 : vector<1x256xf32> to vector<2x256xf32>
    %3 = arith.addf %0, %2 : vector<2x256xf32>
    %c0_3 = arith.constant 0 : index
    %c0_4 = arith.constant 0 : index
    %4 = vector.load %arg4[%c0_3, %c0_4] : memref<2x256xf32, #tpu.memory_space<vmem>>, vector<2x256xf32>
    tpu.vector_store %arg4[%c0_3, %c0_4], %3 {strides = array<i32>} : memref<2x256xf32, #tpu.memory_space<vmem>>, vector<2x256xf32>,
    return
  }
  func.func @transform_0(%arg0: i32, %arg1: i32) -> (i32, i32) {
    %c0_i32 = arith.constant 0 : i32
    return %arg1, %arg0 : i32, i32
  }
  func.func @transform_1(%arg0: i32, %arg1: i32) -> (i32, i32) {
    %c0_i32 = arith.constant 0 : i32
    %c0_i32_0 = arith.constant 0 : i32
    return %c0_i32, %arg0 : i32, i32
  }
  func.func @transform_2(%arg0: i32, %arg1: i32) -> (i32, i32) {
    %c0_i32 = arith.constant 0 : i32
    return %arg1, %arg0 : i32, i32
  }
}

module attributes {stable_mosaic.version = 11 : i64} {
  func.func @_pe_add_kernel(%arg0: i32, %arg1: i32, %arg2: memref<2x256xf32, #tpu.memory_space<vmem>>, %arg3: memref<1x256xf32, #tpu.memory_space<vmem>>, %arg4: memref<2x256xf32, #tpu.memory_space<vmem>>) attributes {dimension_semantics = [#tpu.dimension_semantics<parallel>, #tpu.dimension_semantics<parallel>], iteration_bounds = array<i64: 1, 1>, scalar_prefetch = 0 : i64, scratch_operands = 0 : i64, tpu.core_type = #tpu.core_type<tc>, window_params = [{transform_indices = @transform_0, window_bounds = array<i64: 2, 256>}, {transform_indices = @transform_1, window_bounds = array<i64: 1, 256>}, {transform_indices = @transform_2, window_bounds = array<i64: 2, 256>}]} {
    %c0 = arith.constant 0 : index
    %c0_0 = arith.constant 0 : index
    %0 = vector.load %arg2[%c0, %c0_0] : memref<2x256xf32, #tpu.memory_space<vmem>>, vector<2x256xf32>
    %c0_1 = arith.constant 0 : index
    %c0_2 = arith.constant 0 : index
    %1 = vector.load %arg3[%c0_1, %c0_2] : memref<1x256xf32, #tpu.memory_space<vmem>>, vector<1x256xf32>
    %2 = vector.broadcast %1 : vector<1x256xf32> to vector<2x256xf32>
    %3 = arith.addf %0, %2 : vector<2x256xf32>
    %c0_3 = arith.constant 0 : index
    %c0_4 = arith.constant 0 : index
    %4 = vector.load %arg4[%c0_3, %c0_4] : memref<2x256xf32, #tpu.memory_space<vmem>>, vector<2x256xf32>
    tpu.vector_store %arg4[%c0_3, %c0_4], %3 {strides = array<i32>} : memref<2x256xf32, #tpu.memory_space<vmem>>, vector<2x256xf32>,
    return
  }
  func.func @transform_0(%arg0: i32, %arg1: i32) -> (i32, i32) {
    %c0_i32 = arith.constant 0 : i32
    return %arg1, %arg0 : i32, i32
  }
  func.func @transform_1(%arg0: i32, %arg1: i32) -> (i32, i32) {
    %c0_i32 = arith.constant 0 : i32
    %c0_i32_0 = arith.constant 0 : i32
    return %c0_i32, %arg0 : i32, i32
  }
  func.func @transform_2(%arg0: i32, %arg1: i32) -> (i32, i32) {
    %c0_i32 = arith.constant 0 : i32
    return %arg1, %arg0 : i32, i32
  }
}

</mosaic_0001>

<bundles_post_ra>
// kernel: tpu_custom_call.1
= control target key start
LH: loop header
LB: loop body
LE: loop exit
PB: predicated region body
PF: predicated region fallthrough
CT: control target
= control target key end

     0   :  { %7 = vsyncpa [#allocation3], 0  ;;  %s177_s0 = inlined_call_operand.hbm [shape: f32[2,256], index: 0, kind: input, shape index: {}]   ;;  %s178_s1 = inlined_call_operand.hbm [shape: f32[1,256], index: 1, kind: input, shape index: {}]   ;;  %s179_s2 = inlined_call_operand.hbm [shape: f32[2,256], index: 2, kind: output, shape index: {}]  }
   0x1   :  { %8 = vsyncpa [#allocation6], 0 }
   0x2   :  { %9 = vsyncpa [#allocation4], 0  ;;  %s15_s11 = sshll.u32 %s177_s0, 4  ;;  %s150_s12 = smov [#allocation2]   ;;  %s16_s11 = int_to_ptr.hbm [resolvable:$true] %s15_s11 }
   0x3   :  { %s17_s13 = sshll.u32 %s150_s12, 4  ;;  %s26_s16 = sshll.u32 %s178_s1, 4  ;;  %s18_s13 = int_to_ptr.vmem [resolvable:$true] %s17_s13  ;;  %s27_s16 = int_to_ptr.hbm [resolvable:$true] %s26_s16 }
   0x4   :  { %20 = dma.hbm_to_vmem [thread:$0]  %s16_s11, 64, %s18_s13, [#allocation3]  }
   0x5   :  { %s151_s17 = smov [#allocation5]  }
   0x6   :  { %s28_s18 = sshll.u32 %s151_s17, 4  ;;  %s29_s18 = int_to_ptr.vmem [resolvable:$true] %s28_s18 }
   0x7   :  { %31 = dma.hbm_to_vmem [thread:$0]  %s27_s16, 32, %s29_s18, [#allocation6]  }
   0x8   :  { %144 = dma.done.wait [#allocation3], 64  }
   0x9   :  { %145 = vsyncadd [#allocation3], 4294967232 }
   0xa   :  { %146 = dma.done.wait [#allocation6], 32  }
   0xb   :  { %147 = vsyncadd [#allocation6], 4294967264  ;;  %v41_v0 = vld [vmem:[#allocation5] sm:$0x3]  ;;  %vm46_vm0 = vcmask 1041408   ;;  %s152_s0 = smov [#allocation7]  }
   0xc   :  { %v43_v1 = vperm.slane %v41_v0, 0  ;;  %v44_v2 = vperm.slane %v41_v0, 1  ;;  %v40_v3 = vld [vmem:[#allocation2] sm:$0xf]  ;;  %s56_s19 = sshll.u32 %s152_s0, 4  ;;  %s58_s21 = sshll.u32 %s179_s2, 4  ;;  %s57_s19 = int_to_ptr.vmem [resolvable:$true] %s56_s19  ;;  %s59_s21 = int_to_ptr.hbm [resolvable:$true] %s58_s21 }
   0xe   :  { %v45_v4 = vrot.slane %v44_v2, 6 }
  0x10   :  { %v47_v5 = vsel %vm46_vm0, %v43_v1, %v45_v4 }
  0x11   :  { %v49_v6 = vadd.f32 %v47_v5, %v40_v3 }
  0x13   :  { %50 = vst [vmem:[#allocation7] sm:$0xf] %v49_v6 }
  0x14   :  { %61 = dma.vmem_to_hbm [thread:$0]  %s57_s19, 64, %s59_s21, [#allocation4]  }
  0x15   :  { %148 = dma.done.wait [#allocation4], 64  }
  0x16   :  { %149 = vsyncadd [#allocation4], 4294967232 }
  0x17   :  { %66 = vsyncpa [#allocation3], 1 }
  0x18   :  { %67 = vsyncpa [#allocation6], 1 }
  0x19   :  { %68 = vsyncpa [#allocation4], 1 }

// kernel: tpu_custom_call.1
= control target key start
LH: loop header
LB: loop body
LE: loop exit
PB: predicated region body
PF: predicated region fallthrough
CT: control target
= control target key end

     0   :  { %7 = vsyncpa [#allocation3], 0  ;;  %s177_s0 = inlined_call_operand.hbm [shape: f32[2,256], index: 0, kind: input, shape index: {}]   ;;  %s178_s1 = inlined_call_operand.hbm [shape: f32[1,256], index: 1, kind: input, shape index: {}]   ;;  %s179_s2 = inlined_call_operand.hbm [shape: f32[2,256], index: 2, kind: output, shape index: {}]  }
   0x1   :  { %8 = vsyncpa [#allocation6], 0 }
   0x2   :  { %9 = vsyncpa [#allocation4], 0  ;;  %s15_s11 = sshll.u32 %s177_s0, 4  ;;  %s150_s12 = smov [#allocation2]   ;;  %s16_s11 = int_to_ptr.hbm [resolvable:$true] %s15_s11 }
   0x3   :  { %s17_s13 = sshll.u32 %s150_s12, 4  ;;  %s26_s16 = sshll.u32 %s178_s1, 4  ;;  %s18_s13 = int_to_ptr.vmem [resolvable:$true] %s17_s13  ;;  %s27_s16 = int_to_ptr.hbm [resolvable:$true] %s26_s16 }
   0x4   :  { %20 = dma.hbm_to_vmem [thread:$0]  %s16_s11, 64, %s18_s13, [#allocation3]  }
   0x5   :  { %s151_s17 = smov [#allocation5]  }
   0x6   :  { %s28_s18 = sshll.u32 %s151_s17, 4  ;;  %s29_s18 = int_to_ptr.vmem [resolvable:$true] %s28_s18 }
   0x7   :  { %31 = dma.hbm_to_vmem [thread:$0]  %s27_s16, 32, %s29_s18, [#allocation6]  }
   0x8   :  { %144 = dma.done.wait [#allocation3], 64  }
   0x9   :  { %145 = vsyncadd [#allocation3], 4294967232 }
   0xa   :  { %146 = dma.done.wait [#allocation6], 32  }
   0xb   :  { %147 = vsyncadd [#allocation6], 4294967264  ;;  %v41_v0 = vld [vmem:[#allocation5] sm:$0x3]  ;;  %vm46_vm0 = vcmask 1041408   ;;  %s152_s0 = smov [#allocation7]  }
   0xc   :  { %v43_v1 = vperm.slane %v41_v0, 0  ;;  %v44_v2 = vperm.slane %v41_v0, 1  ;;  %v40_v3 = vld [vmem:[#allocation2] sm:$0xf]  ;;  %s56_s19 = sshll.u32 %s152_s0, 4  ;;  %s58_s21 = sshll.u32 %s179_s2, 4  ;;  %s57_s19 = int_to_ptr.vmem [resolvable:$true] %s56_s19  ;;  %s59_s21 = int_to_ptr.hbm [resolvable:$true] %s58_s21 }
   0xe   :  { %v45_v4 = vrot.slane %v44_v2, 6 }
  0x10   :  { %v47_v5 = vsel %vm46_vm0, %v43_v1, %v45_v4 }
  0x11   :  { %v49_v6 = vadd.f32 %v47_v5, %v40_v3 }
  0x13   :  { %50 = vst [vmem:[#allocation7] sm:$0xf] %v49_v6 }
  0x14   :  { %61 = dma.vmem_to_hbm [thread:$0]  %s57_s19, 64, %s59_s21, [#allocation4]  }
  0x15   :  { %148 = dma.done.wait [#allocation4], 64  }
  0x16   :  { %149 = vsyncadd [#allocation4], 4294967232 }
  0x17   :  { %66 = vsyncpa [#allocation3], 1 }
  0x18   :  { %67 = vsyncpa [#allocation6], 1 }
  0x19   :  { %68 = vsyncpa [#allocation4], 1 }

</bundles_post_ra>
